<compile_context>
chip_gen: v7x
topology: tpu7x:2x2x1
jax: 0.10.0
libtpu: 0.0.40
codegen_flags: <defaults>
</compile_context>

<pallas_src>
import jax
import jax.numpy as jnp
from jax.experimental import pallas as pl
from jax.experimental.pallas import tpu as pltpu


def _relu_kernel(x_ref, o_ref):
    # Elementwise max(x, 0) on the current VMEM tile (pure VPU work).
    o_ref[...] = jnp.maximum(x_ref[...], 0)


# bytes-per-element -> sublane packing multiple (f32:8, bf16/f16:16, int8/fp8:32)
_SUBLANE_PACK = {4: 8, 2: 16, 1: 32}

_LANES = 128                      # lane width; blocks are contiguous in HBM
_SINGLE_BLOCK_BYTES = 256 * 1024  # below this: one full-extent block, grid=(1,)
_MIN_BLOCKS = 8                   # above it: at least ~8 blocks for pipelining


def _chip_tiling():
    """Generation-aware (tile_bytes_cap, vmem_limit_bytes)."""
    try:
        kind = jax.devices()[0].device_kind.lower()
    except Exception:
        kind = ""
    if "v7" in kind or "7x" in kind:
        # v7x: ~3.2 TB/s HBM per TC, 64 MiB VMEM -> 8 MiB tiles (2x2x8=32 MiB
        # double-buffered in+out) hide the ~0.35 us per-step overhead.
        return 8 << 20, 40 << 20
    if "v6" in kind:
        # v6e already ~85% of roofline at 2 MiB; a modest bump buys a bit more.
        return 4 << 20, 32 << 20
    # v5e / default: 2 MiB tiles are at the plateau; override the 16 MiB
    # default scoped-VMEM limit so double-buffering never trips it.
    return 2 << 20, 32 << 20


def _relu_pallas_2d(x2d: jax.Array) -> jax.Array:
    """ReLU over a (rows, 128) lane-aligned slab."""
    rows, lanes = x2d.shape
    dtype = x2d.dtype
    itemsize = jnp.dtype(dtype).itemsize
    pack = _SUBLANE_PACK[itemsize]
    total_bytes = rows * lanes * itemsize
    tile_bytes_cap, vmem_limit = _chip_tiling()

    if total_bytes <= _SINGLE_BLOCK_BYTES:
        # Small input: one full-extent block, no per-step pipeline churn.
        block_rows = rows
        grid = (1,)
    else:
        # Large input: big contiguous tiles, but keep >= _MIN_BLOCKS blocks so
        # input prefetch, compute, and writeback overlap.
        cap_rows = max(pack, tile_bytes_cap // (lanes * itemsize))
        target_rows = min(cap_rows, pl.cdiv(rows, _MIN_BLOCKS))
        block_rows = max(pack, (target_rows // pack) * pack)
        grid = (pl.cdiv(rows, block_rows),)

    return pl.pallas_call(
        _relu_kernel,
        out_shape=jax.ShapeDtypeStruct((rows, lanes), dtype),
        grid_spec=pltpu.PrefetchScalarGridSpec(
            num_scalar_prefetch=0,
            grid=grid,
            in_specs=[pl.BlockSpec((block_rows, lanes), lambda i: (i, 0))],
            out_specs=pl.BlockSpec((block_rows, lanes), lambda i: (i, 0)),
        ),
        compiler_params=pltpu.CompilerParams(
            # TODO(synk): verify in xprof that the 1-D "parallel" grid shards
            # across v7x's two TensorCores; if one core idles, switch to
            # pltpu.CORE_PARALLEL there.
            dimension_semantics=("parallel",),
            vmem_limit_bytes=vmem_limit,
        ),
        cost_estimate=pl.CostEstimate(
            flops=rows * lanes,
            transcendentals=0,
            bytes_accessed=2 * rows * lanes * itemsize,
        ),
    )(x2d)


def relu_pallas(x: jax.Array) -> jax.Array:
    """ReLU over an arbitrary-shaped array via a lane-aligned Pallas kernel."""
    orig_shape = x.shape
    dtype = x.dtype
    n = x.size
    if n == 0:
        return x

    itemsize = jnp.dtype(dtype).itemsize
    if itemsize not in _SUBLANE_PACK:
        # Unsupported element width for TPU vreg packing; plain XLA fallback.
        return jnp.maximum(x, 0)

    x_flat = x.reshape(-1)
    aligned = (n // _LANES) * _LANES
    if aligned == 0:
        # <128 elements: launch overhead dwarfs the work; let XLA fuse it.
        return jnp.maximum(x, 0)

    prefix = x_flat[:aligned].reshape(aligned // _LANES, _LANES)
    out_flat = _relu_pallas_2d(prefix).reshape(-1)

    if aligned != n:
        # Ragged tail (<128 elems): plain XLA max + concat. Costs one extra
        # output pass only on misaligned sizes (vs. two for pad + slice).
        tail = jnp.maximum(x_flat[aligned:], 0)
        out_flat = jnp.concatenate([out_flat, tail])

    return out_flat.reshape(orig_shape)


if __name__ == "__main__":
    # M1 has no parameters; only needs an input tensor (NCHW like PyTorch).
    key = jax.random.PRNGKey(0)
    x = jax.random.normal(key, (2, 4, 16, 16), dtype=jnp.float32)

    y_ref = jnp.maximum(x, 0.0)

    y = relu_pallas(x)
    jax.block_until_ready(y)

    assert y.shape == x.shape and y.dtype == x.dtype
    assert bool(jnp.all(y == y_ref))

    print("KERNEL_OK")
</pallas_src>

<mosaic_0001>
module attributes {stable_mosaic.version = 11 : i64} {
  func.func @_relu_kernel(%arg0: i32, %arg1: memref<16x128xf32, #tpu.memory_space<vmem>>, %arg2: memref<16x128xf32, #tpu.memory_space<vmem>>) attributes {dimension_semantics = [#tpu.dimension_semantics<parallel>], iteration_bounds = array<i64: 1>, scalar_prefetch = 0 : i64, scratch_operands = 0 : i64, tpu.core_type = #tpu.core_type<tc>, window_params = [{transform_indices = @transform_0, window_bounds = array<i64: 16, 128>}, {transform_indices = @transform_1, window_bounds = array<i64: 16, 128>}]} {
    %c0 = arith.constant 0 : index
    %c0_0 = arith.constant 0 : index
    %0 = vector.load %arg1[%c0, %c0_0] : memref<16x128xf32, #tpu.memory_space<vmem>>, vector<16x128xf32>
    %cst = arith.constant 0.000000e+00 : f32
    %1 = vector.broadcast %cst : f32 to vector<16x128xf32>
    %2 = arith.maximumf %0, %1 : vector<16x128xf32>
    %c0_1 = arith.constant 0 : index
    %c0_2 = arith.constant 0 : index
    %3 = vector.load %arg2[%c0_1, %c0_2] : memref<16x128xf32, #tpu.memory_space<vmem>>, vector<16x128xf32>
    tpu.vector_store %arg2[%c0_1, %c0_2], %2 {strides = array<i32>} : memref<16x128xf32, #tpu.memory_space<vmem>>, vector<16x128xf32>,
    return
  }
  func.func @transform_0(%arg0: i32) -> (i32, i32) {
    %c0_i32 = arith.constant 0 : i32
    %c0_i32_0 = arith.constant 0 : i32
    return %arg0, %c0_i32 : i32, i32
  }
  func.func @transform_1(%arg0: i32) -> (i32, i32) {
    %c0_i32 = arith.constant 0 : i32
    %c0_i32_0 = arith.constant 0 : i32
    return %arg0, %c0_i32 : i32, i32
  }
}

</mosaic_0001>

<bundles_post_ra>
// kernel: tpu_custom_call.1
= control target key start
LH: loop header
LB: loop body
LE: loop exit
PB: predicated region body
PF: predicated region fallthrough
CT: control target
= control target key end

     0   :  { %6 = vsyncpa [#allocation3], 0  ;;  %s136_s0 = inlined_call_operand.hbm [shape: f32[16,128], index: 0, kind: input, shape index: {}]   ;;  %s137_s1 = inlined_call_operand.hbm [shape: f32[16,128], index: 1, kind: output, shape index: {}]  }
   0x1   :  { %7 = vsyncpa [#allocation4], 0  ;;  %s98_s6 = smov [#allocation2]   ;;  %s50_s10 = scalar_lea.hbm %s136_s0, 256 }
   0x2   :  { %s13_s7 = sshll.u32 %s98_s6, 4  ;;  %p51_p0 = scmp.ne.s32.totalorder %s136_s0, %s50_s10  ;;  %s14_s7 = int_to_ptr.vmem [resolvable:$true] %s13_s7 }
   0x3   :  { %p54_p1 = scmp.lt.u32.totalorder %s50_s10, %s136_s0 }
   0x5   :  { %p56_p2 = pnand %p54_p1, %p51_p0 }
   0x7   :  { %59 = shalt.err (!%p56_p2)
}
   0x8   :  { %s60_s15 = scalar_lea.vmem %s14_s7, 256  ;;  %p65_p4 = scmp.lt.s32.totalorder %s14_s7, %s14_s7 }
   0x9   :  { %p61_p3 = scmp.ne.s32.totalorder %s14_s7, %s60_s15  ;;  %p66_p5 = scmp.lt.s32.totalorder %s60_s15, %s60_s15 }
   0xb   :  { %p67_p6 = por %p66_p5, %p65_p4 }
   0xd   :  { %p68_p7 = pnand %p67_p6, %p61_p3 }
   0xf   :  { %71 = shalt.err (!%p68_p7)
}
  0x10   :  { %s99_s16 = smov 128   ;;  %s100_s17 = smov 8  }
  0x11   :  { %19 = dma.hbm_to_vmem [thread:$0]  %s136_s0, 256, %s14_s7, [#allocation3], %s99_s16, %s99_s16, %s100_s17  }
  0x12   :  { %94 = dma.done.wait [#allocation3], 256  }
  0x13   :  { %95 = vsyncadd [#allocation3], 4294967040  ;;  %s101_s20 = smov [#allocation5]   ;;  %v23_v0 = vld [vmem:[#allocation2] sm:$0xff]  ;;  %v24_v1 = vld [vmem:[#allocation2 + $0x8] sm:$0xff] }
  0x14   :  { %s34_s21 = sshll.u32 %s101_s20, 4  ;;  %v25_v2 = vmax.f32 %v23_v0, 0.0  ;;  %v26_v3 = vmax.f32 %v24_v1, 0.0  ;;  %s35_s21 = int_to_ptr.vmem [resolvable:$true] %s34_s21 }
  0x15   :  { %s72_s22 = scalar_lea.vmem %s35_s21, 256  ;;  %p77_p9 = scmp.lt.s32.totalorder %s35_s21, %s35_s21 }
  0x16   :  { %27 = vst [vmem:[#allocation5] sm:$0xff] %v25_v2  ;;  %28 = vst [vmem:[#allocation5 + $0x8] sm:$0xff] %v26_v3  ;;  %p73_p8 = scmp.ne.s32.totalorder %s35_s21, %s72_s22  ;;  %p78_p10 = scmp.lt.s32.totalorder %s72_s22, %s72_s22 }
  0x18   :  { %p79_p11 = por %p78_p10, %p77_p9 }
  0x1a   :  { %p80_p12 = pnand %p79_p11, %p73_p8 }
  0x1c   :  { %83 = shalt.err (!%p80_p12)
}
  0x1d   :  { %s84_s24 = scalar_lea.hbm %s137_s1, 256 }
  0x1e   :  { %p85_p13 = scmp.ne.s32.totalorder %s137_s1, %s84_s24  ;;  %p88_p0 = scmp.lt.u32.totalorder %s84_s24, %s137_s1 }
  0x20   :  { %p90_p1 = pnand %p88_p0, %p85_p13 }
  0x22   :  { %93 = shalt.err (!%p90_p1)
}
  0x23   :  { %40 = dma.vmem_to_hbm [thread:$0]  %s35_s21, 256, %s137_s1, [#allocation4], %s99_s16, %s99_s16, %s100_s17  }
  0x24   :  { %96 = dma.done.wait [#allocation4], 256  }
  0x25   :  { %97 = vsyncadd [#allocation4], 4294967040 }
  0x26   :  { %44 = vsyncpa [#allocation3], 1 }
  0x27   :  { %45 = vsyncpa [#allocation4], 1 }

</bundles_post_ra>
